<compile_context>
chip_gen: v7x
topology: tpu7x:2x2x1
jax: 0.10.0
libtpu: 0.0.40
codegen_flags: <defaults>
</compile_context>

<pallas_src>
import math
import functools

import numpy as np
import jax
import jax.numpy as jnp
from jax.experimental import pallas as pl
from jax.experimental.pallas import tpu as pltpu


# ----------------------------------------------------------------------------
# helpers
# ----------------------------------------------------------------------------
def bilinear_matrix(out_size, in_size):
    """PyTorch F.interpolate(mode='bilinear', align_corners=False) as a matrix."""
    i = np.arange(out_size, dtype=np.float64)
    scale = in_size / out_size
    src = (i + 0.5) * scale - 0.5
    src = np.maximum(src, 0.0)                      # PyTorch clamps source coord at 0
    i0 = np.minimum(np.floor(src).astype(np.int64), in_size - 1)
    i1 = np.minimum(i0 + 1, in_size - 1)
    w1 = src - i0
    w0 = 1.0 - w1
    A = np.zeros((out_size, in_size), dtype=np.float64)
    A[np.arange(out_size), i0] += w0
    A[np.arange(out_size), i1] += w1
    return A.astype(np.float32)


def _choose_hw_chunk(hw_pad, b, c, budget_bytes=8 << 20):
    """Largest multiple of 128 that divides hw_pad and whose double-buffered
    x block (2 * b * c * chunk * 4 bytes) stays under a conservative VMEM
    budget (safe for v7x's 64 MiB physical / 32 MiB scoped default)."""
    per_lane = 2 * b * c * 4
    cap = max(128, (budget_bytes // per_lane) // 128 * 128)
    best = 128
    ch = 128
    while ch <= min(hw_pad, cap):
        if hw_pad % ch == 0:
            best = ch
        ch += 128
    return best


def pack_params(prompt_param, fallback_param, H, W):
    """Parameter-only precompute: resize each prompt/fallback plane to (H, W)
    and lay it out flat with the 3x3-conv zero padding baked in.  Rows padded
    to a multiple of 8 so the mix matmul has an MXU-friendly contraction."""
    _, T, D, S, _ = prompt_param.shape
    A_h = jnp.asarray(bilinear_matrix(H, S))
    A_w = jnp.asarray(bilinear_matrix(W, S))
    params = jnp.concatenate([prompt_param[0], fallback_param], axis=0)   # (T+1, D, S, S)
    # bilinear resize commutes with the (linear) prompt mix -> fold into params
    params_up = jnp.einsum('hp,ndpq,wq->ndhw', A_h, params, A_w)          # (T+1, D, H, W)
    # bake the conv's SAME padding: one zero row above/below ...
    pu = jnp.pad(params_up, ((0, 0), (0, 0), (1, 1), (0, 0)))             # (T+1, D, H+2, W)
    pu = pu.reshape(T + 1, D, (H + 2) * W)
    # ... plus one zero element before/after each flat plane
    pu = jnp.pad(pu, ((0, 0), (0, 0), (1, 1)))                            # (T+1, D, Lp)
    pu = pu.reshape(T + 1, -1)                                            # (T+1, D*Lp)
    rows = ((T + 1 + 7) // 8) * 8
    if rows != T + 1:
        pu = jnp.pad(pu, ((0, rows - (T + 1)), (0, 0)))                   # zero rows
    return pu                                                             # (rows, D*Lp)


# ----------------------------------------------------------------------------
# Kernel 1: fused  mean(HW, tiled) -> linear -> softmax -> entropy -> mix
#           (the mix matmul directly produces the padded upsampled activation)
# ----------------------------------------------------------------------------
def _stats_mix_kernel(x_ref, w_ref, b_ref, p_ref, o_ref, acc_ref, *,
                      hw_true, num_classes):
    k = pl.program_id(0)

    @pl.when(k == 0)
    def _():
        acc_ref[...] = jnp.zeros_like(acc_ref)

    # accumulate the spatial sum over the (zero-padded) H*W lane axis
    acc_ref[...] += jnp.sum(x_ref[...], axis=-1)                          # (B, C)

    @pl.when(k == pl.num_programs(0) - 1)
    def _():
        emb = acc_ref[...] * (1.0 / hw_true)                              # mean (B, C)
        logits = jnp.dot(emb, w_ref[...],
                         preferred_element_type=jnp.float32) + b_ref[...]
        m = jnp.max(logits, axis=1, keepdims=True)
        e = jnp.exp(logits - m)
        pw = e / jnp.sum(e, axis=1, keepdims=True)                        # softmax (B, T)
        ent = -jnp.sum(pw * jnp.log(pw + 1e-12), axis=1, keepdims=True)
        fw = ent * (1.0 / math.log(float(num_classes)))                   # (B, 1)
        pad = p_ref.shape[0] - (num_classes + 1)
        parts = [pw, fw]
        if pad:
            parts.append(jnp.zeros((pw.shape[0], pad), jnp.float32))
        w_mix = jnp.concatenate(parts, axis=1)                            # (B, rows)
        # prompt mix + bilinear resize + conv padding all folded into p_ref
        o_ref[...] = jnp.dot(w_mix, p_ref[...],
                             preferred_element_type=jnp.float32).astype(o_ref.dtype)


def fused_stats_mix(x, w_lin, b_lin, params_pad):
    B, C, H, W = x.shape
    T = w_lin.shape[0]
    DLp = params_pad.shape[1]
    hw = H * W
    hw_pad = ((hw + 127) // 128) * 128
    x_flat = x.reshape(B, C, hw)
    if hw_pad != hw:
        # zero padding leaves the spatial sum unchanged; mean uses the true hw
        x_flat = jnp.pad(x_flat, ((0, 0), (0, 0), (0, hw_pad - hw)))
    chunk = _choose_hw_chunk(hw_pad, B, C)
    kernel = functools.partial(_stats_mix_kernel,
                               hw_true=float(hw), num_classes=T)
    return pl.pallas_call(
        kernel,
        out_shape=jax.ShapeDtypeStruct((B, DLp), jnp.float32),
        grid=(hw_pad // chunk,),
        in_specs=[
            pl.BlockSpec((B, C, chunk), lambda k: (0, 0, k)),
            pl.BlockSpec((C, T), lambda k: (0, 0)),
            pl.BlockSpec((1, T), lambda k: (0, 0)),
            pl.BlockSpec(params_pad.shape, lambda k: (0, 0)),
        ],
        out_specs=pl.BlockSpec((B, DLp), lambda k: (0, 0)),
        scratch_shapes=[pltpu.VMEM((B, C), jnp.float32)],
        compiler_params=pltpu.CompilerParams(
            dimension_semantics=("arbitrary",)),
    )(x_flat, w_lin.T, b_lin.reshape(1, -1), params_pad)


# ----------------------------------------------------------------------------
# Kernel 2: 3x3 conv (padding=1, no bias).  Nine flat-shifted tap views are
# stacked along the contraction dim -> one K=9*D MXU matmul; image-edge
# wrap-around is masked so the output is lane-dense (D, H*W), no post-slice.
# ----------------------------------------------------------------------------
def _conv3x3_kernel(xp_ref, w_ref, o_ref, *, H, W):
    # xp_ref: (1, D, Lp)  flat activation with padding baked in,
    #         Lp = (H+2)*W + 2; x[h, w] lives at flat index 1 + (h+1)*W + w
    # w_ref : (D, 9*D)    tap-stacked weights, column k*D + d_in, k = dy*3+dx
    # o_ref : (1, D, H*W) lane-dense output
    HW = H * W
    D = o_ref.shape[1]
    x = xp_ref[0]                                                   # (D, Lp)
    wpos = jax.lax.broadcasted_iota(jnp.int32, (D, HW), 1) % W
    not_left = wpos != 0
    not_right = wpos != W - 1
    taps = []
    for dy in range(3):
        for dx in range(3):
            t = x[:, dy * W + dx: dy * W + dx + HW]                 # flat-shifted tap
            if dx == 0:        # reads that wrapped past the left image edge
                t = jnp.where(not_left, t, 0.0)
            elif dx == 2:      # reads that wrapped past the right image edge
                t = jnp.where(not_right, t, 0.0)
            taps.append(t)
    stacked = jnp.concatenate(taps, axis=0)                         # (9*D, H*W)
    o_ref[0] = jnp.dot(w_ref[...], stacked,
                       preferred_element_type=jnp.float32).astype(o_ref.dtype)


def conv3x3_pallas(up_flat, w_stacked, *, B, D, H, W):
    Lp = (H + 2) * W + 2
    xp = up_flat.reshape(B, D, Lp)                                  # free reshape
    kernel = functools.partial(_conv3x3_kernel, H=H, W=W)
    out = pl.pallas_call(
        kernel,
        out_shape=jax.ShapeDtypeStruct((B, D, H * W), jnp.float32),
        grid=(B,),
        in_specs=[
            pl.BlockSpec((1, D, Lp), lambda b: (b, 0, 0)),
            pl.BlockSpec((D, 9 * D), lambda b: (0, 0)),
        ],
        out_specs=pl.BlockSpec((1, D, H * W), lambda b: (b, 0, 0)),
        compiler_params=pltpu.CompilerParams(
            dimension_semantics=("parallel",)),
    )(xp, w_stacked)
    return out.reshape(B, D, H, W)                                  # free reshape


# ----------------------------------------------------------------------------
# Full forward pass
# ----------------------------------------------------------------------------
def fallback_prompt_block(x, prompt_param, fallback_param, w_lin, b_lin, conv_w):
    B, C, H, W = x.shape
    _, T, D, S, _ = prompt_param.shape

    # parameter-only precompute (resize + pad folded into the packed params)
    params_pad = pack_params(prompt_param, fallback_param, H, W)

    # 1) fused stats + mix -> padded, upsampled activation (B, D*Lp)
    up_flat = fused_stats_mix(x, w_lin, b_lin, params_pad)

    # 2) 3x3 conv, padding=1, no bias (tap-stacked weights, parameter-only prep)
    w_stacked = jnp.transpose(conv_w, (0, 2, 3, 1)).reshape(D, 9 * D)
    return conv3x3_pallas(up_flat, w_stacked, B=B, D=D, H=H, W=W)


# ----------------------------------------------------------------------------
# Pure-JAX reference (original op order) to check the Pallas kernels
# ----------------------------------------------------------------------------
def reference(x, prompt_param, fallback_param, w_lin, b_lin, conv_w):
    B, C, H, W = x.shape
    _, T, D, S, _ = prompt_param.shape
    emb = x.mean(axis=(-2, -1))
    logits = emb @ w_lin.T + b_lin
    pw = jax.nn.softmax(logits, axis=1)
    ent = -jnp.sum(pw * jnp.log(pw + 1e-12), axis=1, keepdims=True)
    fw = ent / jnp.log(jnp.float32(T))
    prompt = (jnp.einsum('bt,tdhw->bdhw', pw, prompt_param[0])
              + fw[:, :, None, None] * fallback_param)
    A_h = jnp.asarray(bilinear_matrix(H, S))
    A_w = jnp.asarray(bilinear_matrix(W, S))
    up = jnp.einsum('hp,bdpq,wq->bdhw', A_h, prompt, A_w)
    out = jax.lax.conv_general_dilated(
        up, conv_w, window_strides=(1, 1), padding='SAME',
        dimension_numbers=('NCHW', 'OIHW', 'NCHW'))
    return out


if __name__ == "__main__":
    # Small shapes consistent with the module: lin_dim == C of the input.
    B, lin_dim, H, W = 2, 16, 16, 16
    prompt_dim, prompt_len, prompt_size = 8, 5, 8
    T = prompt_len - 1
    D, S = prompt_dim, prompt_size

    key = jax.random.PRNGKey(0)
    k0, k1, k2, k3, k4, k5 = jax.random.split(key, 6)

    prompt_param = jax.random.uniform(k0, (1, T, D, S, S), dtype=jnp.float32)
    fallback_param = jax.random.uniform(k1, (1, D, S, S), dtype=jnp.float32)
    k_lin = 1.0 / math.sqrt(lin_dim)
    w_lin = jax.random.uniform(k2, (T, lin_dim), minval=-k_lin, maxval=k_lin,
                               dtype=jnp.float32)
    b_lin = jax.random.uniform(k3, (T,), minval=-k_lin, maxval=k_lin,
                               dtype=jnp.float32)
    k_conv = 1.0 / math.sqrt(D * 9)
    conv_w = jax.random.uniform(k4, (D, D, 3, 3), minval=-k_conv, maxval=k_conv,
                                dtype=jnp.float32)

    x = jax.random.normal(k5, (B, lin_dim, H, W), dtype=jnp.float32)

    out = fallback_prompt_block(x, prompt_param, fallback_param,
                                w_lin, b_lin, conv_w)
    out = jax.block_until_ready(out)

    ref = jax.block_until_ready(
        reference(x, prompt_param, fallback_param, w_lin, b_lin, conv_w))

    assert out.shape == (B, D, H, W), out.shape
    assert bool(jnp.all(jnp.isfinite(out)))
    np.testing.assert_allclose(np.asarray(out), np.asarray(ref),
                               rtol=2e-3, atol=2e-3)
    print("KERNEL_OK")
</pallas_src>

<mosaic_0001>
module attributes {stable_mosaic.version = 11 : i64} {
  func.func @_stats_mix_kernel(%arg0: i32, %arg1: memref<2x16x256xf32, #tpu.memory_space<vmem>>, %arg2: memref<16x4xf32, #tpu.memory_space<vmem>>, %arg3: memref<1x4xf32, #tpu.memory_space<vmem>>, %arg4: memref<8x2320xf32, #tpu.memory_space<vmem>>, %arg5: memref<2x2320xf32, #tpu.memory_space<vmem>>, %arg6: memref<2x16xf32, #tpu.memory_space<vmem>>) attributes {dimension_semantics = [#tpu.dimension_semantics<arbitrary>], iteration_bounds = array<i64: 1>, scalar_prefetch = 0 : i64, scratch_operands = 1 : i64, tpu.core_type = #tpu.core_type<tc>, window_params = [{transform_indices = @transform_0, window_bounds = array<i64: 2, 16, 256>}, {pipeline_mode = #tpu.pipeline_mode<synchronous>, transform_indices = @transform_1, window_bounds = array<i64: 16, 4>}, {pipeline_mode = #tpu.pipeline_mode<synchronous>, transform_indices = @transform_2, window_bounds = array<i64: 1, 4>}, {pipeline_mode = #tpu.pipeline_mode<synchronous>, transform_indices = @transform_3, window_bounds = array<i64: 8, 2320>}, {pipeline_mode = #tpu.pipeline_mode<synchronous>, transform_indices = @transform_4, window_bounds = array<i64: 2, 2320>}]} {
    %c0_i32 = arith.constant 0 : i32
    %0 = arith.cmpi eq, %arg0, %c0_i32 : i32
    %1 = arith.extui %0 : i1 to i32
    %c0_i32_0 = arith.constant 0 : i32
    %2 = arith.cmpi ne, %1, %c0_i32_0 : i32
    scf.if %2 {
      %cst_9 = arith.constant 0.000000e+00 : f32
      %11 = vector.broadcast %cst_9 : f32 to vector<2x16xf32>
      %c0_10 = arith.constant 0 : index
      %c0_11 = arith.constant 0 : index
      %12 = vector.load %arg6[%c0_10, %c0_11] : memref<2x16xf32, #tpu.memory_space<vmem>>, vector<2x16xf32>
      tpu.vector_store %arg6[%c0_10, %c0_11], %11 {strides = array<i32>} : memref<2x16xf32, #tpu.memory_space<vmem>>, vector<2x16xf32>,
    } else {
    }
    %c0 = arith.constant 0 : index
    %c0_1 = arith.constant 0 : index
    %3 = vector.load %arg6[%c0, %c0_1] : memref<2x16xf32, #tpu.memory_space<vmem>>, vector<2x16xf32>
    %c0_2 = arith.constant 0 : index
    %c0_3 = arith.constant 0 : index
    %c0_4 = arith.constant 0 : index
    %4 = vector.load %arg1[%c0_2, %c0_3, %c0_4] : memref<2x16x256xf32, #tpu.memory_space<vmem>>, vector<2x16x256xf32>
    %cst = arith.constant dense<0.000000e+00> : vector<2x16xf32>
    %5 = vector.multi_reduction <add>, %4, %cst [2] : vector<2x16x256xf32> to vector<2x16xf32>
    %6 = arith.addf %3, %5 : vector<2x16xf32>
    %c0_5 = arith.constant 0 : index
    %c0_6 = arith.constant 0 : index
    %7 = vector.load %arg6[%c0_5, %c0_6] : memref<2x16xf32, #tpu.memory_space<vmem>>, vector<2x16xf32>
    tpu.vector_store %arg6[%c0_5, %c0_6], %6 {strides = array<i32>} : memref<2x16xf32, #tpu.memory_space<vmem>>, vector<2x16xf32>,
    %c0_i32_7 = arith.constant 0 : i32
    %8 = arith.cmpi eq, %arg0, %c0_i32_7 : i32
    %9 = arith.extui %8 : i1 to i32
    %c0_i32_8 = arith.constant 0 : i32
    %10 = arith.cmpi ne, %9, %c0_i32_8 : i32
    scf.if %10 {
      %c0_9 = arith.constant 0 : index
      %c0_10 = arith.constant 0 : index
      %11 = vector.load %arg6[%c0_9, %c0_10] : memref<2x16xf32, #tpu.memory_space<vmem>>, vector<2x16xf32>
      %cst_11 = arith.constant 3.906250e-03 : f32
      %12 = vector.broadcast %cst_11 : f32 to vector<2x16xf32>
      %13 = arith.mulf %11, %12 : vector<2x16xf32>
      %c0_12 = arith.constant 0 : index
      %c0_13 = arith.constant 0 : index
      %14 = vector.load %arg2[%c0_12, %c0_13] : memref<16x4xf32, #tpu.memory_space<vmem>>, vector<16x4xf32>
      %cst_14 = arith.constant dense<0.000000e+00> : vector<2x4xf32>
      %15 = tpu.matmul %13, %14, %cst_14 {dimension_numbers = #tpu.dot_dimension_numbers<[1], [0], [0], [1], [0, 0, 1, 1], [], []>} : vector<2x16xf32>, vector<16x4xf32>, vector<2x4xf32> -> vector<2x4xf32>
      %c0_15 = arith.constant 0 : index
      %c0_16 = arith.constant 0 : index
      %16 = vector.load %arg3[%c0_15, %c0_16] : memref<1x4xf32, #tpu.memory_space<vmem>>, vector<1x4xf32>
      %17 = vector.broadcast %16 : vector<1x4xf32> to vector<2x4xf32>
      %18 = arith.addf %15, %17 : vector<2x4xf32>
      %cst_17 = arith.constant dense<0xFF800000> : vector<2xf32>
      %19 = vector.multi_reduction <maximumf>, %18, %cst_17 [1] : vector<2x4xf32> to vector<2xf32>
      %20 = vector.shape_cast %19 : vector<2xf32> to vector<2x1xf32>
      %21 = vector.broadcast %20 : vector<2x1xf32> to vector<2x4xf32>
      %22 = arith.subf %18, %21 : vector<2x4xf32>
      %23 = math.exp %22 : vector<2x4xf32>
      %cst_18 = arith.constant dense<0.000000e+00> : vector<2xf32>
      %24 = vector.multi_reduction <add>, %23, %cst_18 [1] : vector<2x4xf32> to vector<2xf32>
      %25 = vector.shape_cast %24 : vector<2xf32> to vector<2x1xf32>
      %26 = vector.broadcast %25 : vector<2x1xf32> to vector<2x4xf32>
      %27 = arith.divf %23, %26 : vector<2x4xf32>
      %cst_19 = arith.constant 9.99999996E-13 : f32
      %28 = vector.broadcast %cst_19 : f32 to vector<2x4xf32>
      %29 = arith.addf %27, %28 : vector<2x4xf32>
      %30 = math.log %29 : vector<2x4xf32>
      %31 = arith.mulf %27, %30 : vector<2x4xf32>
      %cst_20 = arith.constant dense<0.000000e+00> : vector<2xf32>
      %32 = vector.multi_reduction <add>, %31, %cst_20 [1] : vector<2x4xf32> to vector<2xf32>
      %33 = vector.shape_cast %32 : vector<2xf32> to vector<2x1xf32>
      %cst_21 = arith.constant 0.000000e+00 : f32
      %34 = vector.broadcast %cst_21 : f32 to vector<2x1xf32>
      %35 = arith.subf %34, %33 : vector<2x1xf32>
      %cst_22 = arith.constant 0.72134751 : f32
      %36 = vector.broadcast %cst_22 : f32 to vector<2x1xf32>
      %37 = arith.mulf %35, %36 : vector<2x1xf32>
      %cst_23 = arith.constant 0.000000e+00 : f32
      %38 = vector.broadcast %cst_23 : f32 to vector<2x3xf32>
      %39 = tpu.concatenate %27, %37, %38 in 1 : vector<2x4xf32>, vector<2x1xf32>, vector<2x3xf32> -> vector<2x8xf32>
      %c0_24 = arith.constant 0 : index
      %c0_25 = arith.constant 0 : index
      %40 = vector.load %arg4[%c0_24, %c0_25] : memref<8x2320xf32, #tpu.memory_space<vmem>>, vector<8x2320xf32>
      %cst_26 = arith.constant dense<0.000000e+00> : vector<2x2320xf32>
      %41 = tpu.matmul %39, %40, %cst_26 {dimension_numbers = #tpu.dot_dimension_numbers<[1], [0], [0], [1], [0, 0, 1, 1], [], []>} : vector<2x8xf32>, vector<8x2320xf32>, vector<2x2320xf32> -> vector<2x2320xf32>
      %c0_27 = arith.constant 0 : index
      %c0_28 = arith.constant 0 : index
      %42 = vector.load %arg5[%c0_27, %c0_28] : memref<2x2320xf32, #tpu.memory_space<vmem>>, vector<2x2320xf32>
      tpu.vector_store %arg5[%c0_27, %c0_28], %41 {strides = array<i32>} : memref<2x2320xf32, #tpu.memory_space<vmem>>, vector<2x2320xf32>,
    } else {
    }
    return
  }
  func.func @transform_0(%arg0: i32) -> (i32, i32, i32) {
    %c0_i32 = arith.constant 0 : i32
    %c0_i32_0 = arith.constant 0 : i32
    %c0_i32_1 = arith.constant 0 : i32
    return %c0_i32, %c0_i32_0, %arg0 : i32, i32, i32
  }
  func.func @transform_1(%arg0: i32) -> (i32, i32) {
    %c0_i32 = arith.constant 0 : i32
    %c0_i32_0 = arith.constant 0 : i32
    %c0_i32_1 = arith.constant 0 : i32
    return %c0_i32, %c0_i32_0 : i32, i32
  }
  func.func @transform_2(%arg0: i32) -> (i32, i32) {
    %c0_i32 = arith.constant 0 : i32
    %c0_i32_0 = arith.constant 0 : i32
    %c0_i32_1 = arith.constant 0 : i32
    return %c0_i32, %c0_i32_0 : i32, i32
  }
  func.func @transform_3(%arg0: i32) -> (i32, i32) {
    %c0_i32 = arith.constant 0 : i32
    %c0_i32_0 = arith.constant 0 : i32
    %c0_i32_1 = arith.constant 0 : i32
    return %c0_i32, %c0_i32_0 : i32, i32
  }
  func.func @transform_4(%arg0: i32) -> (i32, i32) {
    %c0_i32 = arith.constant 0 : i32
    %c0_i32_0 = arith.constant 0 : i32
    %c0_i32_1 = arith.constant 0 : i32
    return %c0_i32, %c0_i32_0 : i32, i32
  }
}

</mosaic_0001>

<bundles_post_ra>
// kernel: tpu_custom_call.1
= control target key start
LH: loop header
LB: loop body
LE: loop exit
PB: predicated region body
PF: predicated region fallthrough
CT: control target
= control target key end

     0   :  { %9 = vsyncpa [#allocation4], 0  ;;  %s1315_s0 = inlined_call_operand.hbm [shape: f32[2,16,256], index: 0, kind: input, shape index: {}]   ;;  %s1316_s1 = inlined_call_operand.vmem [shape: f32[16,4], index: 1, kind: input, shape index: {}]   ;;  %s1317_s2 = inlined_call_operand.vmem [shape: f32[1,4], index: 2, kind: input, shape index: {}]   ;;  %s1318_s3 = inlined_call_operand.hbm [shape: f32[8,2320], index: 3, kind: input, shape index: {}]   ;;  %s1319_s4 = inlined_call_operand.hbm [shape: f32[2,2320], index: 4, kind: output, shape index: {}]  }
   0x1   :  { %10 = vsyncpa [#allocation7], 0 }
   0x2   :  { %11 = vsyncpa [#allocation5], 0  ;;  %s1201_s15 = smov [#allocation3]   ;;  %s1129_s19 = scalar_lea.hbm %s1315_s0, 1024 }
   0x3   :  { %s17_s16 = sshll.u32 %s1201_s15, 4  ;;  %p1130_p0 = scmp.ne.s32.totalorder %s1315_s0, %s1129_s19  ;;  %s18_s16 = int_to_ptr.vmem [resolvable:$true] %s17_s16 }
   0x4   :  { %p1133_p1 = scmp.lt.u32.totalorder %s1129_s19, %s1315_s0 }
   0x6   :  { %p1135_p2 = pnand %p1133_p1, %p1130_p0 }
   0x8   :  { %1138 = shalt.err (!%p1135_p2)
}
   0x9   :  { %s1139_s24 = scalar_lea.vmem %s18_s16, 1024  ;;  %p1144_p4 = scmp.lt.s32.totalorder %s18_s16, %s18_s16 }
   0xa   :  { %p1140_p3 = scmp.ne.s32.totalorder %s18_s16, %s1139_s24  ;;  %p1145_p5 = scmp.lt.s32.totalorder %s1139_s24, %s1139_s24 }
   0xc   :  { %p1146_p6 = por %p1145_p5, %p1144_p4 }
   0xe   :  { %p1147_p7 = pnand %p1146_p6, %p1140_p3 }
  0x10   :  { %1150 = shalt.err (!%p1147_p7)
}
  0x11   :  { %s1202_s25 = smov 256   ;;  %s1203_s26 = smov 16  }
  0x12   :  { %23 = dma.hbm_to_vmem [thread:$0]  %s1315_s0, 1024, %s18_s16, [#allocation4], %s1202_s25, %s1202_s25, %s1203_s26  }
  0x13   :  { %s1204_s29 = smov [#allocation6]   ;;  %s1151_s7 = scalar_lea.hbm %s1318_s3, 2432 }
  0x14   :  { %s34_s30 = sshll.u32 %s1204_s29, 4  ;;  %p1152_p8 = scmp.ne.s32.totalorder %s1318_s3, %s1151_s7  ;;  %s35_s30 = int_to_ptr.vmem [resolvable:$true] %s34_s30 }
  0x15   :  { %p1155_p9 = scmp.lt.u32.totalorder %s1151_s7, %s1318_s3 }
  0x17   :  { %p1157_p10 = pnand %p1155_p9, %p1152_p8 }
  0x19   :  { %1160 = shalt.err (!%p1157_p10)
}
  0x1a   :  { %s1161_s12 = scalar_lea.vmem %s35_s30, 2432  ;;  %p1166_p12 = scmp.lt.s32.totalorder %s35_s30, %s35_s30 }
  0x1b   :  { %p1162_p11 = scmp.ne.s32.totalorder %s35_s30, %s1161_s12  ;;  %p1167_p13 = scmp.lt.s32.totalorder %s1161_s12, %s1161_s12 }
  0x1d   :  { %p1168_p0 = por %p1167_p13, %p1166_p12 }
  0x1f   :  { %p1169_p1 = pnand %p1168_p0, %p1162_p11 }
  0x21   :  { %1172 = shalt.err (!%p1169_p1)
}
  0x22   :  { %37 = dma.hbm_to_vmem [thread:$0]  %s1318_s3, 2432, %s35_s30, [#allocation7]  }
  0x23   :  { %1195 = dma.done.wait [#allocation4], 1024  }
  0x24   :  { %1196 = vsyncadd [#allocation4], 4294966272 }
  0x25   :  { %1197 = dma.done.wait [#allocation7], 2432  }
  0x26   :  { %1198 = vsyncadd [#allocation7], 4294964864  ;;  %v55_v0 = vld [vmem:[#allocation3 + $0x20] sm:$0xff]  ;;  %v56_v1 = vld [vmem:[#allocation3 + $0x28] sm:$0xff]  ;;  %vm48_vm0 = vcmask 123904   ;;  %v1205_v12 = vmov 0.0   ;;  %v75_v17 = vlaneseq }
  0x27   :  { %v51_v2 = vld [vmem:[#allocation3] sm:$0xff]  ;;  %v65_v3 = vadd.f32 %v56_v1, %v55_v0  ;;  %v52_v4 = vld [vmem:[#allocation3 + $0x8] sm:$0xff]  ;;  %v57_v5 = vld [vmem:[#allocation3 + $0x30] sm:$0xff]  ;;  %49 = vst.msk [vmem:[#allocation2] sm:$0x3] %vm48_vm0, %v1205_v12  ;;  %303 = vmatprep.mubr.f32.mxu1 %v1205_v12  ;;  %v1206_v15 = vmov 0.0|0.0  }
  0x28   :  { %v58_v6 = vld [vmem:[#allocation3 + $0x38] sm:$0xff]  ;;  %v59_v7 = vadd.f32 %v52_v4, %v51_v2  ;;  %v53_v8 = vld [vmem:[#allocation3 + $0x10] sm:$0xff]  ;;  %v109_v14 = vld [vmem:[%s1316_s1 + $0x8] sm:$0xff]  ;;  %1111 = vmatprep.subr.bf16.mxu0 %v1206_v15  ;;  %vm1207_vm1 = vmmov 0   ;;  %v76_v18 = vand.u32 127, %v75_v17  ;;  %v1270_v19 = vshrl.u32 %v75_v17, 7 }
  0x29   :  { %v54_v9 = vld [vmem:[#allocation3 + $0x18] sm:$0xff]  ;;  %66 = vadd.xlane.f32.xlu1 %v65_v3  ;;  %v68_v10 = vadd.f32 %v58_v6, %v57_v5  ;;  %1103 = vmatprep.mubr.msk.f32.mxu0 %vm1207_vm1, %v1205_v12  ;;  %vm86_vm2 = vcmask 130112   ;;  %vm97_vm3 = vcmask 1041409   ;;  %vm117_vm4 = vcmask 130048   ;;  %v217_v56 = vld [vmem:[#allocation6 + $0x8] sm:$0xff]  ;;  %v216_v58 = vld [vmem:[#allocation6] sm:$0xff] }
  0x2a   :  { %60 = vadd.xlane.f32.xlu0 %v59_v7  ;;  %v62_v11 = vadd.f32 %v54_v9, %v53_v8  ;;  %v108_v13 = vld [vmem:[%s1316_s1] sm:$0xff]  ;;  %v81_v20 = vadd.s32 4294967288, %v76_v18  ;;  %v79_v22 = vsub.s32 %v76_v18, %v1270_v19  ;;  %vm191_vm5 = vcmask 25600   ;;  %v221_v57 = vld [vmem:[#allocation6 + $0x28] sm:$0xff]  ;;  %239 = vmatprep.subr.mxu1 %v217_v56  ;;  %v218_v2 = vld [vmem:[#allocation6 + $0x10] sm:$0xff] }
  0x2b   :  { %v1112_v16 = vpack.c.bf16 %v109_v14, %v108_v13  ;;  %v1082_v38 = vld [vmem:[%s1317_s2] ss:$0 sm:$0xff]  ;;  %v220_v59 = vld [vmem:[#allocation6 + $0x20] sm:$0xff]  ;;  %240 = vmatpush1.msra.mxu1 %v216_v58  ;;  %v225_v61 = vld [vmem:[#allocation6 + $0x48] sm:$0xff]  ;;  %vm212_vm6 = vcmask 31744   ;;  %vm214_vm7 = vcmask 39936  }
  0x2c   :  { %v84_v24 = vsub.s32 %v81_v20, %v1270_v19  ;;  %v219_v60 = vld [vmem:[#allocation6 + $0x18] sm:$0xff]  ;;  %vm235_vm8 = vcmask 64512   ;;  %v224_v5 = vld [vmem:[#allocation6 + $0x40] sm:$0xff]  ;;  %v229_v6 = vld [vmem:[#allocation6 + $0x68] sm:$0xff]  ;;  %v1208_v17 = vmov 1983009808  }
  0x2d   :  { %69 = vadd.xlane.f32.xlu1 %v68_v10  ;;  %1113 = vmatpush3.bf16.msra.mxu0 %v1112_v16  ;;  %v223_v4 = vld [vmem:[#allocation6 + $0x38] sm:$0xff]  ;;  %v222_v7 = vld [vmem:[#allocation6 + $0x30] sm:$0xff]  ;;  %v228_v9 = vld [vmem:[#allocation6 + $0x60] sm:$0xff]  ;;  %v970_v18 = vunpack.c.l.s4 %v1208_v17  ;;  %vm1060_vm9 = vcmask 1041408   ;;  %vm1061_vm10 = vcmask 1043458   ;;  %vm1063_vm12 = vcmask 128004  }
  0x2e   :  { %63 = vadd.xlane.f32.xlu0 %v62_v11  ;;  %v50_v32 = vld [vmem:[#allocation2] sm:$0x3]  ;;  %381 = vmatprep.subr.mxu0 %v221_v57  ;;  %v233_v10 = vld [vmem:[#allocation6 + $0x88] sm:$0xff]  ;;  %v226_v11 = vld [vmem:[#allocation6 + $0x50] sm:$0xff]  ;;  %s1209_s2 = smov [#allocation8]  }
  0x2f   :  { %310 = vmatprep.subr.mxu1 %v219_v60  ;;  %v227_v8 = vld [vmem:[#allocation6 + $0x58] sm:$0xff]  ;;  %v232_v14 = vld [vmem:[#allocation6 + $0x80] sm:$0xff]  ;;  %v230_v15 = vld [vmem:[#allocation6 + $0x70] sm:$0xff]  ;;  %v971_v20 = vunpack.c.0.s8 %v970_v18  ;;  %s1072_s18 = sshll.u32 %s1209_s2, 4  ;;  %s1073_s18 = int_to_ptr.vmem [resolvable:$true] %s1072_s18 }
  0x30   :  { %v231_v13 = vld [vmem:[#allocation6 + $0x78] sm:$0xff]  ;;  %v234_v16 = vld [vmem:[#allocation6 + $0x90] sm:$0xff]  ;;  %vm1062_vm11 = vmor %vm1061_vm10, %vm1060_vm9  ;;  %s1173_s19 = scalar_lea.vmem %s1073_s18, 608  ;;  %p1178_p3 = scmp.lt.s32.totalorder %s1073_s18, %s1073_s18 }
  0x31   :  { %vm1064_vm13 = vmor %vm1063_vm12, %vm1062_vm11  ;;  %p1174_p2 = scmp.ne.s32.totalorder %s1073_s18, %s1173_s19  ;;  %p1179_p4 = scmp.lt.s32.totalorder %s1173_s19, %s1173_s19 }
  0x33   :  { %p1180_p5 = por %p1179_p4, %p1178_p3 }
  0x35   :  { %p1181_p6 = pnand %p1180_p5, %p1174_p2 }
  0xb6   :  { %v67_v21 = vpop.xlane.xlu1 %66 }
  0xb7   :  { %v61_v23 = vpop.xlane.xlu0 %60  ;;  %v91_v26 = vrot.slane %v67_v21, %v79_v22  ;;  %v974_v21 = vsub.s32 %v971_v20, %v1270_v19 }
  0xb8   :  { %v80_v29 = vrot.slane %v61_v23, %v79_v22 }
  0xba   :  { %v70_v25 = vpop.xlane.xlu1 %69 }
  0xbb   :  { %v95_v27 = vrot.slane %v70_v25, %v84_v24  ;;  %v64_v28 = vpop.xlane.xlu0 %63 }
  0xbc   :  { %v85_v30 = vrot.slane %v64_v28, %v84_v24 }
  0xbd   :  { %v96_v31 = vsel %vm86_vm2, %v95_v27, %v91_v26 }
  0xbe   :  { %v87_v33 = vsel %vm86_vm2, %v85_v30, %v80_v29 }
  0xbf   :  { %v98_v34 = vsel %vm97_vm3, %v96_v31, %v87_v33 }
  0xc0   :  { %v100_v35 = vadd.f32 %v98_v34, %v50_v32 }
  0xc2   :  { %102 = vst.msk [vmem:[#allocation2] sm:$0x3] %vm48_vm0, %v100_v35 }
  0xc9   :  { %v106_v36 = vld [vmem:[#allocation2] sm:$0x3] }
  0xca   :  { %v107_v37 = vmul.f32 0.00390625, %v106_v36 }
  0xcc   :  { %1104 = vmatmul.mubr.msk.f32.vlgmr.msra.gmra.mrb[0].mxu0 %vm117_vm4, %v107_v37 }
  0xcd   :  { %445 = vmatprep.mubr.f32.mxu0 %v1205_v12  ;;  %382 = vmatpush1.msra.mxu0 %v220_v59 }
  0xce   :  { %523 = vmatprep.subr.mxu0 %v225_v61 }
 0x19f   :  { %v187_v39 = vpop.f32.mrb[0].mxu0 }
 0x1a0   :  { %v188_v40 = vadd.f32 %v1082_v38, %v187_v39  ;;  %v1105_v41 = vpop.f32.mrb[1].mxu0 }
 0x1a2   :  { %v192_v42 = vsel %vm191_vm5, %v188_v40, -inf }
 0x1a3   :  { %193 = vmax.xlane.f32.xlu0 %v192_v42 }
 0x230   :  { %v194_v43 = vpop.xlane.xlu0 %193 }
 0x231   :  { %v195_v44 = vsub.f32 %v188_v40, %v194_v43 }
 0x233   :  { %v196_v45 = vmul.f32 1.442695, %v195_v44 }
 0x235   :  { %1123 = vpow2.f32 %v196_v45 }
 0x23f   :  { %v1124_v46 = vpop.eup %1123 }
 0x240   :  { %v198_v47 = vsel %vm191_vm5, %v1124_v46, 0.0 }
 0x241   :  { %199 = vadd.xlane.f32.xlu1 %v198_v47 }
 0x2ce   :  { %v200_v48 = vpop.xlane.xlu1 %199 }
 0x2cf   :  { %1125 = vrcp.f32 %v200_v48 }
 0x2d9   :  { %v1126_v49 = vpop.eup %1125 }
 0x2da   :  { %v202_v50 = vmul.f32 %v1126_v49, %v1124_v46 }
 0x2dc   :  { %v203_v51 = vadd.f32 1e-12, %v202_v50 }
 0x2de   :  { %1127 = vlog2.f32 %v203_v51 }
 0x2e8   :  { %v1128_v52 = vpop.eup %1127 }
 0x2e9   :  { %v205_v53 = vmul.f32 0.6931472, %v1128_v52 }
 0x2eb   :  { %v206_v54 = vmul.f32 %v205_v53, %v202_v50 }
 0x2ed   :  { %v207_v55 = vsel %vm191_vm5, %v206_v54, 0.0 }
 0x2ee   :  { %208 = vadd.xlane.f32.xlu0 %v207_v55 }
 0x37b   :  { %v209_v62 = vpop.xlane.xlu0 %208 }
 0x37c   :  { %v210_v63 = vsub.f32 0.0, %v209_v62 }
 0x37e   :  { %v211_v0 = vmul.f32 0.7213475, %v210_v63 }
 0x380   :  { %v213_v1 = vsel %vm212_vm6, %v202_v50, %v211_v0 }
 0x381   :  { %v215_v3 = vsel %vm214_vm7, %v213_v1, 0.0 }
 0x382   :  { %1084 = vmatmul.mubr.msk.f32.vlgmr.msra.gmra.mrb[0].mxu1 %vm235_vm8, %v215_v3  ;;  %1086 = vmatmul.mubr.msk.f32.vlgmr.msra.gmra.mrb[2].mxu0 %vm235_vm8, %v215_v3 }
 0x383   :  { %311 = vmatpush1.msra.mxu1 %v218_v2  ;;  %374 = vmatprep.mubr.f32.mxu1 %v1205_v12 }
 0x384   :  { %452 = vmatprep.subr.mxu1 %v223_v4  ;;  %524 = vmatpush1.msra.mxu0 %v224_v5 }
 0x385   :  { %587 = vmatprep.mubr.f32.mxu0 %v1205_v12  ;;  %665 = vmatprep.subr.mxu0 %v229_v6 }
 0x386   :  { %1085 = vmatmul.mubr.msk.f32.vlgmr.msra.gmra.mrb[2].mxu1 %vm235_vm8, %v215_v3  ;;  %1088 = vmatmul.mubr.msk.f32.vlgmr.msra.gmra.mrb[4].mxu0 %vm235_vm8, %v215_v3 }
 0x387   :  { %453 = vmatpush1.msra.mxu1 %v222_v7  ;;  %516 = vmatprep.mubr.f32.mxu1 %v1205_v12 }
 0x388   :  { %594 = vmatprep.subr.mxu1 %v227_v8  ;;  %666 = vmatpush1.msra.mxu0 %v228_v9 }
 0x389   :  { %729 = vmatprep.mubr.f32.mxu0 %v1205_v12  ;;  %807 = vmatprep.subr.mxu0 %v233_v10 }
 0x38a   :  { %1087 = vmatmul.mubr.msk.f32.vlgmr.msra.gmra.mrb[4].mxu1 %vm235_vm8, %v215_v3  ;;  %1090 = vmatmul.mubr.msk.f32.vlgmr.msra.gmra.mrb[6].mxu0 %vm235_vm8, %v215_v3 }
 0x38b   :  { %595 = vmatpush1.msra.mxu1 %v226_v11  ;;  %658 = vmatprep.mubr.f32.mxu1 %v1205_v12 }
 0x38c   :  { %736 = vmatprep.subr.mxu1 %v231_v13  ;;  %808 = vmatpush1.msra.mxu0 %v232_v14 }
 0x38d   :  { %871 = vmatprep.mubr.f32.mxu0 %v1205_v12 }
 0x38e   :  { %1089 = vmatmul.mubr.msk.f32.vlgmr.msra.gmra.mrb[6].mxu1 %vm235_vm8, %v215_v3  ;;  %1092 = vmatmul.mubr.msk.f32.vlgmr.msra.gmra.mrb[8].mxu0 %vm235_vm8, %v215_v3 }
 0x38f   :  { %737 = vmatpush1.msra.mxu1 %v230_v15  ;;  %800 = vmatprep.mubr.f32.mxu1 %v1205_v12 }
 0x390   :  { %1106 = vmatprep.subr.mxu1 %v1205_v12 }
 0x392   :  { %1091 = vmatmul.mubr.msk.f32.vlgmr.msra.gmra.mrb[8].mxu1 %vm235_vm8, %v215_v3 }
 0x393   :  { %1107 = vmatpush3.msra.mxu1 %v234_v16  ;;  %1108 = vmatprep.mubr.msk.f32.mxu1 %vm1207_vm1, %v1205_v12 }
 0x396   :  { %1109 = vmatmul.mubr.msk.f32.vlgmr.msra.gmra.mrb[10].mxu1 %vm235_vm8, %v215_v3 }
 0x455   :  { %v305_v22 = vpop.f32.mrb[0].mxu1  ;;  %v447_v23 = vpop.f32.mrb[2].mxu0 }
 0x456   :  { %v307_v24 = vpop.f32.mrb[1].mxu1  ;;  %v449_v25 = vpop.f32.mrb[3].mxu0 }
 0x457   :  { %v967_v26 = vcombine.low %v305_v22, %v307_v24  ;;  %v984_v27 = vcombine.low %v447_v23, %v449_v25 }
 0x459   :  { %v975_v28 = vrot.slane %v967_v26, %v974_v21  ;;  %v992_v29 = vrot.slane %v984_v27, %v974_v21  ;;  %v376_v30 = vpop.f32.mrb[2].mxu1  ;;  %v589_v31 = vpop.f32.mrb[4].mxu0 }
 0x45a   :  { %v378_v32 = vpop.f32.mrb[3].mxu1  ;;  %v591_v33 = vpop.f32.mrb[5].mxu0 }
 0x45b   :  { %v968_v12 = vcombine.low %v376_v30, %v378_v32  ;;  %v1001_v34 = vcombine.low %v589_v31, %v591_v33 }
 0x45d   :  { %v982_v35 = vrot.slane %v968_v12, %v974_v21  ;;  %v1009_v36 = vrot.slane %v1001_v34, %v974_v21  ;;  %v518_v37 = vpop.f32.mrb[4].mxu1  ;;  %v731_v38 = vpop.f32.mrb[6].mxu0 }
 0x45e   :  { %v520_v39 = vpop.f32.mrb[5].mxu1  ;;  %v733_v19 = vpop.f32.mrb[7].mxu0 }
 0x45f   :  { %v983_v40 = vcombine.low %v975_v28, %v982_v35  ;;  %v985_v41 = vcombine.low %v518_v37, %v520_v39  ;;  %v1018_v42 = vcombine.low %v731_v38, %v733_v19 }
 0x461   :  { %1056 = vst [vmem:[#allocation8] sm:$0xff] %v983_v40  ;;  %v999_v43 = vrot.slane %v985_v41, %v974_v21  ;;  %v1026_v44 = vrot.slane %v1018_v42, %v974_v21  ;;  %v660_v45 = vpop.f32.mrb[6].mxu1  ;;  %v873_v46 = vpop.f32.mrb[8].mxu0 }
 0x462   :  { %v662_v47 = vpop.f32.mrb[7].mxu1  ;;  %v875_v48 = vpop.f32.mrb[9].mxu0 }
 0x463   :  { %v1000_v49 = vcombine.low %v992_v29, %v999_v43  ;;  %v1002_v50 = vcombine.low %v660_v45, %v662_v47  ;;  %v1035_v51 = vcombine.low %v873_v46, %v875_v48 }
 0x465   :  { %1057 = vst [vmem:[#allocation8 + $0x8] sm:$0xff] %v1000_v49  ;;  %v1016_v52 = vrot.slane %v1002_v50, %v974_v21  ;;  %v1042_v53 = vrot.slane %v1035_v51, %v974_v21  ;;  %v802_v54 = vpop.f32.mrb[8].mxu1 }
 0x466   :  { %v804_v55 = vpop.f32.mrb[9].mxu1 }
 0x467   :  { %v1017_v56 = vcombine.low %v1009_v36, %v1016_v52  ;;  %v1019_v57 = vcombine.low %v802_v54, %v804_v55 }
 0x469   :  { %1058 = vst [vmem:[#allocation8 + $0x10] sm:$0xff] %v1017_v56  ;;  %v1033_v58 = vrot.slane %v1019_v57, %v974_v21  ;;  %v944_v59 = vpop.f32.mrb[10].mxu1 }
 0x46a   :  { %v1049_v60 = vrot.slane %v944_v59, %v974_v21  ;;  %v1110_v61 = vpop.f32.mrb[11].mxu1 }
 0x46b   :  { %v1034_v62 = vcombine.low %v1026_v44, %v1033_v58 }
 0x46c   :  { %v1050_v63 = vcombine.low %v1042_v53, %v1049_v60 }
 0x46d   :  { %1059 = vst [vmem:[#allocation8 + $0x18] sm:$0xff] %v1034_v62 }
 0x46e   :  { %1065 = vst.msk [vmem:[#allocation8 + $0x20] sm:$0x3f] %vm1064_vm13, %v1050_v63 }
 0x46f   :  { %1184 = shalt.err (!%p1181_p6)
}
 0x470   :  { %s1185_s22 = scalar_lea.hbm %s1319_s4, 608 }
 0x471   :  { %p1186_p7 = scmp.ne.s32.totalorder %s1319_s4, %s1185_s22  ;;  %p1189_p8 = scmp.lt.u32.totalorder %s1185_s22, %s1319_s4 }
 0x473   :  { %p1191_p9 = pnand %p1189_p8, %p1186_p7 }
 0x475   :  { %1194 = shalt.err (!%p1191_p9)
}
 0x476   :  { %1075 = dma.vmem_to_hbm [thread:$0]  %s1073_s18, 608, %s1319_s4, [#allocation5]  }
 0x477   :  { %1199 = dma.done.wait [#allocation5], 608  }
 0x478   :  { %1200 = vsyncadd [#allocation5], 4294966688 }
 0x479   :  { %1079 = vsyncpa [#allocation4], 1 }
 0x47a   :  { %1080 = vsyncpa [#allocation7], 1 }
 0x47b   :  { %1081 = vsyncpa [#allocation5], 1 }

</bundles_post_ra>
